<compile_context>
chip_gen: v5e
topology: v5e:2x2
jax: 0.10.0
libtpu: 0.0.40
codegen_flags: <defaults>
</compile_context>

<pallas_src>
import math

import jax
import jax.numpy as jnp
from jax.experimental import pallas as pl
from jax.experimental.pallas import tpu as pltpu

LOG1E4 = math.log(10000.0)
HALF_PI = math.pi / 2.0   # f32-rounded pi/2: sin(x + pi/2) ~ cos(x) to ~4e-8


def sinusoidal_embedding_param(dim: int) -> jax.Array:
    """The module's nn.Parameter: arange(dim//2) * -(log(1e4) / (dim//2 - 1))."""
    assert dim % 2 == 0, "dim must be even"
    assert dim >= 4, "half_dim must be > 1 (scale divides by half_dim - 1)"
    half = dim // 2
    scale = LOG1E4 / (half - 1)
    return jnp.arange(half, dtype=jnp.float32) * (-scale)


# ---------------------------------------------------------------------------
# Kernel
# ---------------------------------------------------------------------------
def sincos_kernel(t_ref, tbl_ref, o_ref):
    """o[r, j*dim + k] = sin(t[r, j] * freq[k] + phase[k]).

    t_ref:   (tb, g)          g packed batch elements per output row
    tbl_ref: (g + 1, g*dim)   rows 0..g-1: freq masked to column block j
                              row g: phase ([0]*half + [pi/2]*half, tiled g x)
    o_ref:   (tb, g*dim)      lane-dense (g*dim is a multiple of 128, or = dim)
    """
    g = t_ref.shape[1]
    x = tbl_ref[g:g + 1, :]                         # phase row, (1, g*dim)
    for j in range(g):                              # static unroll; g is tiny
        # (tb, 1) * (1, g*dim) broadcast-FMA on the VPU; exact f32.
        x = x + t_ref[:, j:j + 1] * tbl_ref[j:j + 1, :]
    # [sin | cos] phase-folded into a single sin -> one EUP pass, no concat.
    o_ref[...] = jnp.sin(x).astype(o_ref.dtype)


# ---------------------------------------------------------------------------
# Host-side preparation (done once) and wrapper
# ---------------------------------------------------------------------------
def prepare_sinusoidal_params(embedding: jax.Array):
    """Build the packed parameter table once (review: don't rebuild per call)."""
    half = int(embedding.shape[0])
    dim = 2 * half
    freq = jnp.concatenate([embedding, embedding]).astype(jnp.float32)    # (dim,)
    phase = jnp.concatenate([jnp.zeros((half,), jnp.float32),
                             jnp.full((half,), HALF_PI, jnp.float32)])    # (dim,)

    if dim % 128 == 0:
        g = 1                      # already lane-dense
    elif 128 % dim == 0:
        g = 128 // dim             # pack g batch rows per 128-lane output row
    else:
        g = 1                      # TODO(synk): non power-of-two dims stay lane-sparse
    width = g * dim

    tbl = jnp.zeros((g + 1, width), jnp.float32)
    for j in range(g):
        tbl = tbl.at[j, j * dim:(j + 1) * dim].set(freq)
    tbl = tbl.at[g, :].set(jnp.tile(phase, g))
    return tbl, g, dim


def _round_down8(v):
    return (v // 8) * 8


def _pick_block_rows(rows, width, *, target_bytes=4 << 20, min_steps=2):
    """Large tiles (amortise ~0.35 us/step) within v5e's 16 MiB scoped VMEM."""
    if rows <= 8:
        return rows
    cap = max(8, target_bytes // (width * 4))        # ~4 MiB output tile
    tb = max(8, _round_down8(min(rows, cap)))
    if rows >= min_steps * 8:
        # >= 2 grid steps so ("parallel",) shards across v7x's two TensorCores.
        per_core = -(-rows // min_steps)
        tb = min(tb, ((per_core + 7) // 8) * 8)
    return max(tb, 8)


def sinusoidal_position_embeddings(t, prepared, *, block_rows=None):
    """t: (b,) float -> (b, dim) f32.  `prepared` = prepare_sinusoidal_params(emb)."""
    tbl, g, dim = prepared
    width = g * dim
    b = t.shape[0]
    b_pad = -(-b // g) * g

    t32 = t.astype(jnp.float32)
    if b_pad != b:
        t32 = jnp.pad(t32, (0, b_pad - b))
    rows = b_pad // g
    t2 = t32.reshape(rows, g)

    if rows <= 8:
        tb = rows
    elif block_rows is None:
        tb = _pick_block_rows(rows, width)
    else:
        tb = max(8, _round_down8(min(block_rows, rows)))

    out = pl.pallas_call(
        sincos_kernel,
        out_shape=jax.ShapeDtypeStruct((rows, width), jnp.float32),
        grid=(pl.cdiv(rows, tb),),
        in_specs=[
            pl.BlockSpec((tb, g), lambda i: (i, 0)),      # t tiled on batch
            pl.BlockSpec(tbl.shape, lambda i: (0, 0)),    # table stays resident
        ],
        out_specs=pl.BlockSpec((tb, width), lambda i: (i, 0)),
        compiler_params=pltpu.CompilerParams(
            dimension_semantics=("parallel",)),
    )(t2, tbl)

    # Packed rows are contiguous: (rows, g*dim) -> (rows*g, dim) is a free
    # row-major reshape; then slice off the batch padding.
    return out.reshape(b_pad, dim)[:b]


# ---------------------------------------------------------------------------
# Pure-JAX reference (the module's forward, literally)
# ---------------------------------------------------------------------------
def sinusoidal_position_embeddings_ref(t, embedding):
    x = jnp.outer(t, embedding)
    return jnp.concatenate([jnp.sin(x), jnp.cos(x)], axis=-1)


if __name__ == "__main__":
    key = jax.random.PRNGKey(0)
    k1, k2 = jax.random.split(key)

    # 1) Small shape consistent with the module: batch=8, dim=32 (g=4 packing).
    DIM, B = 32, 8
    emb = sinusoidal_embedding_param(DIM)
    prepared = prepare_sinusoidal_params(emb)
    t = jax.random.uniform(k1, (B,), jnp.float32)
    out = jax.block_until_ready(sinusoidal_position_embeddings(t, prepared))
    ref = sinusoidal_position_embeddings_ref(t, emb)
    assert out.shape == (B, DIM)
    assert bool(jnp.allclose(out, ref, atol=1e-5, rtol=1e-5))

    # 2) Uneven batch, multi-step "parallel" grid, g=2 packing, partial tiles.
    DIM2, B2 = 64, 1003
    emb2 = sinusoidal_embedding_param(DIM2)
    prepared2 = prepare_sinusoidal_params(emb2)
    t2 = jax.random.uniform(k2, (B2,), jnp.float32)
    out2 = jax.block_until_ready(sinusoidal_position_embeddings(t2, prepared2))
    ref2 = sinusoidal_position_embeddings_ref(t2, emb2)
    assert out2.shape == (B2, DIM2)
    assert bool(jnp.allclose(out2, ref2, atol=1e-5, rtol=1e-5))

    print("KERNEL_OK")
</pallas_src>

<mosaic_0001>
module attributes {stable_mosaic.version = 11 : i64} {
  func.func @sincos_kernel(%arg0: i32, %arg1: memref<2x4xf32, #tpu.memory_space<vmem>>, %arg2: memref<5x128xf32, #tpu.memory_space<vmem>>, %arg3: memref<2x128xf32, #tpu.memory_space<vmem>>) attributes {dimension_semantics = [#tpu.dimension_semantics<parallel>], iteration_bounds = array<i64: 1>, scalar_prefetch = 0 : i64, scratch_operands = 0 : i64, tpu.core_type = #tpu.core_type<tc>, window_params = [{transform_indices = @transform_0, window_bounds = array<i64: 2, 4>}, {pipeline_mode = #tpu.pipeline_mode<synchronous>, transform_indices = @transform_1, window_bounds = array<i64: 5, 128>}, {transform_indices = @transform_2, window_bounds = array<i64: 2, 128>}]} {
    %c4 = arith.constant 4 : index
    %c0 = arith.constant 0 : index
    %0 = vector.load %arg2[%c4, %c0] : memref<5x128xf32, #tpu.memory_space<vmem>>, vector<1x128xf32>
    %c0_0 = arith.constant 0 : index
    %c0_1 = arith.constant 0 : index
    %1 = vector.load %arg1[%c0_0, %c0_1] : memref<2x4xf32, #tpu.memory_space<vmem>>, vector<2x1xf32>
    %c0_2 = arith.constant 0 : index
    %c0_3 = arith.constant 0 : index
    %2 = vector.load %arg2[%c0_2, %c0_3] : memref<5x128xf32, #tpu.memory_space<vmem>>, vector<1x128xf32>
    %3 = vector.broadcast %1 : vector<2x1xf32> to vector<2x128xf32>
    %4 = vector.broadcast %2 : vector<1x128xf32> to vector<2x128xf32>
    %5 = arith.mulf %3, %4 : vector<2x128xf32>
    %6 = vector.broadcast %0 : vector<1x128xf32> to vector<2x128xf32>
    %7 = arith.addf %6, %5 : vector<2x128xf32>
    %c0_4 = arith.constant 0 : index
    %c1 = arith.constant 1 : index
    %8 = vector.load %arg1[%c0_4, %c1] : memref<2x4xf32, #tpu.memory_space<vmem>>, vector<2x1xf32>
    %c1_5 = arith.constant 1 : index
    %c0_6 = arith.constant 0 : index
    %9 = vector.load %arg2[%c1_5, %c0_6] : memref<5x128xf32, #tpu.memory_space<vmem>>, vector<1x128xf32>
    %10 = vector.broadcast %8 : vector<2x1xf32> to vector<2x128xf32>
    %11 = vector.broadcast %9 : vector<1x128xf32> to vector<2x128xf32>
    %12 = arith.mulf %10, %11 : vector<2x128xf32>
    %13 = arith.addf %7, %12 : vector<2x128xf32>
    %c0_7 = arith.constant 0 : index
    %c2 = arith.constant 2 : index
    %14 = vector.load %arg1[%c0_7, %c2] : memref<2x4xf32, #tpu.memory_space<vmem>>, vector<2x1xf32>
    %c2_8 = arith.constant 2 : index
    %c0_9 = arith.constant 0 : index
    %15 = vector.load %arg2[%c2_8, %c0_9] : memref<5x128xf32, #tpu.memory_space<vmem>>, vector<1x128xf32>
    %16 = vector.broadcast %14 : vector<2x1xf32> to vector<2x128xf32>
    %17 = vector.broadcast %15 : vector<1x128xf32> to vector<2x128xf32>
    %18 = arith.mulf %16, %17 : vector<2x128xf32>
    %19 = arith.addf %13, %18 : vector<2x128xf32>
    %c0_10 = arith.constant 0 : index
    %c3 = arith.constant 3 : index
    %20 = vector.load %arg1[%c0_10, %c3] : memref<2x4xf32, #tpu.memory_space<vmem>>, vector<2x1xf32>
    %c3_11 = arith.constant 3 : index
    %c0_12 = arith.constant 0 : index
    %21 = vector.load %arg2[%c3_11, %c0_12] : memref<5x128xf32, #tpu.memory_space<vmem>>, vector<1x128xf32>
    %22 = vector.broadcast %20 : vector<2x1xf32> to vector<2x128xf32>
    %23 = vector.broadcast %21 : vector<1x128xf32> to vector<2x128xf32>
    %24 = arith.mulf %22, %23 : vector<2x128xf32>
    %25 = arith.addf %19, %24 : vector<2x128xf32>
    %26 = math.sin %25 : vector<2x128xf32>
    %c0_13 = arith.constant 0 : index
    %c0_14 = arith.constant 0 : index
    %27 = vector.load %arg3[%c0_13, %c0_14] : memref<2x128xf32, #tpu.memory_space<vmem>>, vector<2x128xf32>
    tpu.vector_store %arg3[%c0_13, %c0_14], %26 {strides = array<i32>} : memref<2x128xf32, #tpu.memory_space<vmem>>, vector<2x128xf32>,
    return
  }
  func.func @transform_0(%arg0: i32) -> (i32, i32) {
    %c0_i32 = arith.constant 0 : i32
    %c0_i32_0 = arith.constant 0 : i32
    return %arg0, %c0_i32 : i32, i32
  }
  func.func @transform_1(%arg0: i32) -> (i32, i32) {
    %c0_i32 = arith.constant 0 : i32
    %c0_i32_0 = arith.constant 0 : i32
    %c0_i32_1 = arith.constant 0 : i32
    return %c0_i32, %c0_i32_0 : i32, i32
  }
  func.func @transform_2(%arg0: i32) -> (i32, i32) {
    %c0_i32 = arith.constant 0 : i32
    %c0_i32_0 = arith.constant 0 : i32
    return %arg0, %c0_i32 : i32, i32
  }
}

</mosaic_0001>

<bundles_post_ra>
// kernel: tpu_custom_call.1
= control target key start
LH: loop header
LB: loop body
LE: loop exit
PB: predicated region body
PF: predicated region fallthrough
CT: control target
= control target key end

     0   :  { %7 = vsyncpa [#allocation3], 0  ;;  %s452_s0 = inlined_call_operand.hbm [shape: f32[2,4], index: 0, kind: input, shape index: {}]   ;;  %s453_s1 = inlined_call_operand.hbm [shape: f32[5,128], index: 1, kind: input, shape index: {}]   ;;  %s454_s2 = inlined_call_operand.hbm [shape: f32[2,128], index: 2, kind: output, shape index: {}]  }
   0x1   :  { %8 = vsyncpa [#allocation6], 0 }
   0x2   :  { %9 = vsyncpa [#allocation4], 0  ;;  %s15_s11 = sshll.u32 %s452_s0, 4  ;;  %s354_s12 = smov [#allocation2]   ;;  %s16_s11 = int_to_ptr.hbm [resolvable:$true] %s15_s11 }
   0x3   :  { %s17_s13 = sshll.u32 %s354_s12, 4  ;;  %s26_s16 = sshll.u32 %s453_s1, 4  ;;  %s18_s13 = int_to_ptr.vmem [resolvable:$true] %s17_s13  ;;  %s27_s16 = int_to_ptr.hbm [resolvable:$true] %s26_s16 }
   0x4   :  { %20 = dma.hbm_to_vmem [thread:$0]  %s16_s11, 32, %s18_s13, [#allocation3]  }
   0x5   :  { %s355_s17 = smov [#allocation5]  }
   0x6   :  { %s28_s18 = sshll.u32 %s355_s17, 4  ;;  %s29_s18 = int_to_ptr.vmem [resolvable:$true] %s28_s18 }
   0x7   :  { %31 = dma.hbm_to_vmem [thread:$0]  %s27_s16, 128, %s29_s18, [#allocation6]  }
   0x8   :  { %348 = dma.done.wait [#allocation3], 32  }
   0x9   :  { %349 = vsyncadd [#allocation3], 4294967264 }
   0xa   :  { %350 = dma.done.wait [#allocation6], 128  }
   0xb   :  { %351 = vsyncadd [#allocation6], 4294967168  ;;  %v356_v0 = vmov 0   ;;  %v357_v1 = vmov 2   ;;  %v41_v2 = vld [vmem:[#allocation2] sm:$0x3] }
   0xc   :  { %266 = vset.pattern.permute.xlu0 %v356_v0  ;;  %268 = vset.pattern.permute.xlu1 %v357_v1  ;;  %v358_v3 = vmov 1   ;;  %v359_v4 = vmov 3   ;;  %v271_v7 = vld [vmem:[#allocation5] ss:$0 sm:$0xff]  ;;  %v272_v9 = vld [vmem:[#allocation5 + $0x4] ss:$0 sm:$0xff] }
   0xd   :  { %45 = vperm.xlu0 %266, %v41_v2   ;;  %62 = vperm.xlu1 %268, %v41_v2   ;;  %v274_v10 = vld [vmem:[#allocation5 + $0x1] ss:$0 sm:$0xff]  ;;  %v273_v11 = vld [vmem:[#allocation5 + $0x2] ss:$0 sm:$0xff]  ;;  %v275_v12 = vld [vmem:[#allocation5 + $0x3] ss:$0 sm:$0xff] }
   0xe   :  { %v360_v33 = vmov 683565275   ;;  %v361_v35 = vmov 2475754826   ;;  %v362_v38 = vmov 2131351028  }
   0xf   :  { %v363_v41 = vmov 2102212464   ;;  %v364_v44 = vmov 920167782   ;;  %v365_v47 = vmov 1326507024  }
  0x10   :  { %s366_s0 = smov [#allocation7]   ;;  %s239_s21 = sshll.u32 %s454_s2, 4  ;;  %s240_s21 = int_to_ptr.hbm [resolvable:$true] %s239_s21 }
  0x11   :  { %s237_s1 = sshll.u32 %s366_s0, 4  ;;  %s238_s1 = int_to_ptr.vmem [resolvable:$true] %s237_s1 }
  0x15   :  { %267 = vset.pattern.permute.xlu0 %v358_v3  ;;  %269 = vset.pattern.permute.xlu1 %v359_v4 }
  0x16   :  { %54 = vperm.xlu0 %267, %v41_v2   ;;  %70 = vperm.xlu1 %269, %v41_v2  }
  0x1e   :  { %270 = vset.pattern.permute.xlu0 %v359_v4 }
  0x7f   :  { %v46_v5 = vpop.permute.xlu0 %45  ;;  %v63_v6 = vpop.permute.xlu1 %62 }
  0x80   :  { %v49_v8 = vmul.f32 %v271_v7, %v46_v5  ;;  %v66_v17 = vmul.f32 %v273_v11, %v63_v6 }
  0x82   :  { %v51_v15 = vadd.f32 %v272_v9, %v49_v8 }
  0x88   :  { %v55_v13 = vpop.permute.xlu0 %54  ;;  %v71_v14 = vpop.permute.xlu1 %70 }
  0x89   :  { %v58_v16 = vmul.f32 %v274_v10, %v55_v13  ;;  %v74_v19 = vmul.f32 %v275_v12, %v71_v14 }
  0x8b   :  { %v59_v18 = vadd.f32 %v58_v16, %v51_v15 }
  0x8d   :  { %v67_v20 = vadd.f32 %v66_v17, %v59_v18 }
  0x8f   :  { %v389_v21 = vadd.f32 %v74_v19, %v67_v20 }
  0x91   :  { %v79_v22 = vand.u32 2139095040, %v389_v21  ;;  %v76_v25 = vand.u32 2147483647, %v389_v21  ;;  %vm78_vm12 = vcmp.lt.s32.totalorder %v389_v21, 0 }
  0x93   :  { %v80_v23 = vshrl.u32 %v79_v22, 23  ;;  %v83_v27 = vand.u32 8388607, %v76_v25  ;;  %vm77_vm13 = vcmp.le.f32.partialorder %v76_v25, 0.7853982 }
  0x95   :  { %v250_v24 = vadd.s32 4294967169, %v80_v23  ;;  %v84_v31 = vor.u32 8388608, %v83_v27 }
  0x97   :  { %v86_v26 = vadd.s32 1, %v250_v24  ;;  %v406_v54 = vshll.u32 %v84_v31, 8 }
  0x99   :  { %vm87_vm0 = vcmp.gt.s32.totalorder %v86_v26, 0  ;;  %v125_v63 = vand.u32 65535, %v406_v54  ;;  %v126_v5 = vshrl.u32 %v406_v54, 16 }
  0x9a   :  { %v88_v28 = vsel %vm87_vm0, %v86_v26, 0 }
  0x9b   :  { %v90_v29 = vand.u32 31, %v88_v28  ;;  %v397_v32 = vshrl.u32 %v88_v28, 5 }
  0x9d   :  { %v395_v30 = vsub.s32 32, %v90_v29  ;;  %v93_v34 = vshll.u32 %v360_v33, %v90_v29  ;;  %v96_v36 = vshll.u32 %v361_v35, %v90_v29  ;;  %v99_v40 = vshll.u32 %v362_v38, %v90_v29 }
  0x9e   :  { %v102_v43 = vshll.u32 %v363_v41, %v90_v29  ;;  %v105_v46 = vshll.u32 %v364_v44, %v90_v29  ;;  %vm108_vm1 = vcmp.lt.s32.totalorder %v397_v32, 1  ;;  %vm111_vm2 = vcmp.lt.s32.totalorder %v397_v32, 4 }
  0x9f   :  { %v94_v37 = vshrl.u32 %v361_v35, %v395_v30  ;;  %v97_v39 = vshrl.u32 %v362_v38, %v395_v30  ;;  %v100_v42 = vshrl.u32 %v363_v41, %v395_v30  ;;  %v103_v45 = vshrl.u32 %v364_v44, %v395_v30 }
  0xa0   :  { %v106_v48 = vshrl.u32 %v365_v47, %v395_v30  ;;  %vm110_vm3 = vcmp.lt.s32.totalorder %v397_v32, 3  ;;  %vm109_vm4 = vcmp.lt.s32.totalorder %v397_v32, 2  ;;  %v92_v27 = vshrl.u32 %v360_v33, %v395_v30 }
  0xa1   :  { %v95_v49 = vor.u32 %v94_v37, %v93_v34  ;;  %v98_v50 = vor.u32 %v97_v39, %v96_v36  ;;  %v101_v51 = vor.u32 %v100_v42, %v99_v40  ;;  %v104_v52 = vor.u32 %v103_v45, %v102_v43 }
  0xa2   :  { %v107_v53 = vor.u32 %v106_v48, %v105_v46 }
  0xa3   :  { %v116_v55 = vsel %vm108_vm1, %v95_v49, %v98_v50  ;;  %v120_v56 = vsel %vm108_vm1, %v98_v50, %v101_v51  ;;  %v117_v57 = vsel %vm111_vm2, %v104_v52, 920167782  ;;  %v113_v20 = vsel %vm111_vm2, %v101_v51, 2102212464 }
  0xa4   :  { %v121_v58 = vsel %vm111_vm2, %v107_v53, 1326507024  ;;  %v118_v59 = vsel %vm110_vm3, %v101_v51, %v117_v57  ;;  %v112_v37 = vsel %vm108_vm1, %v92_v27, %v95_v49  ;;  %v114_v38 = vsel %vm110_vm3, %v98_v50, %v113_v20 }
  0xa5   :  { %v122_v60 = vsel %vm110_vm3, %v104_v52, %v121_v58  ;;  %v119_v61 = vsel %vm109_vm4, %v116_v55, %v118_v59  ;;  %v115_v30 = vsel %vm109_vm4, %v112_v37, %v114_v38  ;;  %vm219_vm1 = vweird.f32 %v389_v21 }
  0xa6   :  { %v123_v62 = vsel %vm109_vm4, %v120_v56, %v122_v60  ;;  %v149_v3 = vand.u32 65535, %v119_v61  ;;  %v150_v4 = vshrl.u32 %v119_v61, 16  ;;  %v169_v45 = vmul.u32 %v406_v54, %v115_v30 }
  0xa7   :  { %v127_v1 = vand.u32 65535, %v123_v62  ;;  %v128_v2 = vshrl.u32 %v123_v62, 16 }
  0xa8   :  { %v152_v7 = vmul.u32 %v150_v4, %v125_v63  ;;  %v153_v9 = vmul.u32 %v149_v3, %v126_v5  ;;  %v151_v12 = vmul.u32 %v149_v3, %v125_v63  ;;  %v154_v15 = vmul.u32 %v150_v4, %v126_v5 }
  0xa9   :  { %v130_v6 = vmul.u32 %v128_v2, %v125_v63  ;;  %v131_v8 = vmul.u32 %v127_v1, %v126_v5  ;;  %v129_v10 = vmul.u32 %v127_v1, %v125_v63  ;;  %v132_v14 = vmul.u32 %v128_v2, %v126_v5 }
  0xaa   :  { %v155_v13 = vshll.u32 %v152_v7, 16  ;;  %v157_v17 = vshll.u32 %v153_v9, 16  ;;  %v156_v35 = vshrl.u32 %v152_v7, 16  ;;  %v158_v41 = vshrl.u32 %v153_v9, 16 }
  0xab   :  { %v133_v11 = vshll.u32 %v130_v6, 16  ;;  %v135_v16 = vshll.u32 %v131_v8, 16  ;;  %v134_v31 = vshrl.u32 %v130_v6, 16  ;;  %v136_v39 = vshrl.u32 %v131_v8, 16 }
  0xac   :  { %vm159_vm6 = vc.u32 %v151_v12, %v155_v13  ;;  %v161_v19 = vadd.s32 %v155_v13, %v151_v12 }
  0xad   :  { %vm137_vm5 = vc.u32 %v129_v10, %v133_v11  ;;  %v139_v18 = vadd.s32 %v133_v11, %v129_v10  ;;  %v160_v23 = vsel %vm159_vm6, 1, %v356_v0 }
  0xae   :  { %v138_v22 = vsel %vm137_vm5, 1, %v356_v0  ;;  %v162_v26 = vadd.s32 %v160_v23, %v154_v15  ;;  %vm163_vm8 = vc.u32 %v161_v19, %v157_v17  ;;  %v165_v43 = vadd.s32 %v161_v19, %v157_v17 }
  0xaf   :  { %v140_v24 = vadd.s32 %v138_v22, %v132_v14  ;;  %vm141_vm7 = vc.u32 %v139_v18, %v135_v16  ;;  %v164_v29 = vsel %vm163_vm8, 1, %v356_v0 }
  0xb0   :  { %v142_v28 = vsel %vm141_vm7, 1, %v356_v0  ;;  %v166_v36 = vadd.s32 %v164_v29, %v162_v26 }
  0xb1   :  { %v144_v34 = vadd.s32 %v142_v28, %v140_v24 }
  0xb2   :  { %v167_v42 = vadd.s32 %v166_v36, %v156_v35 }
  0xb3   :  { %v145_v40 = vadd.s32 %v144_v34, %v134_v31 }
  0xb4   :  { %v168_v0 = vadd.s32 %v167_v42, %v158_v41 }
  0xb5   :  { %v146_v33 = vadd.s32 %v145_v40, %v136_v39 }
  0xb6   :  { %v172_v44 = vadd.s32 1, %v168_v0 }
  0xb7   :  { %vm171_vm9 = vc.u32 %v146_v33, %v165_v43  ;;  %v170_v57 = vadd.s32 %v165_v43, %v146_v33 }
  0xb8   :  { %v173_v46 = vsel %vm171_vm9, %v172_v44, %v168_v0 }
  0xb9   :  { %v174_v47 = vadd.s32 %v173_v46, %v169_v45 }
  0xbb   :  { %v175_v48 = vadd.s32 536870912, %v174_v47 }
  0xbd   :  { %v176_v49 = vshrl.u32 %v175_v48, 30 }
  0xbf   :  { %v177_v51 = vshll.u32 %v176_v49, 30  ;;  %v200_v7 = vsub.s32 4, %v176_v49 }
  0xc1   :  { %v178_v50 = vsub.s32 %v174_v47, %v177_v51  ;;  %v201_v12 = vsel %vm78_vm12, %v200_v7, %v176_v49 }
  0xc2   :  { %v203_v15 = vsel %vm77_vm13, 0, %v201_v12 }
  0xc3   :  { %vm179_vm10 = vcmp.lt.s32.totalorder %v178_v50, 0  ;;  %v180_v52 = vsub.s32 0, %v178_v50  ;;  %v220_v20 = vadd.s32 3, %v203_v15 }
  0xc5   :  { %v181_v53 = vsel %vm179_vm10, %v180_v52, %v178_v50  ;;  %v221_v26 = vand.u32 3, %v220_v20 }
  0xc6   :  { %v182_v55 = vclz %v181_v53 }
  0xc7   :  { %vm223_vm14 = vcmp.eq.s32.totalorder %v221_v26, 0  ;;  %vm226_vm15 = vcmp.eq.s32.totalorder %v221_v26, 2  ;;  %vm222_vm0 = vcmp.lt.s32.totalorder %v221_v26, 2 }
  0xc8   :  { %v251_v56 = vadd.s32 4294967294, %v182_v55 }
  0xca   :  { %vm252_vm11 = vcmp.lt.s32.totalorder %v251_v56, 0 }
  0xcb   :  { %v185_v32 = vsel %vm252_vm11, 0, %v251_v56 }
  0xcc   :  { %v186_v58 = vsub.s32 32, %v185_v32  ;;  %v190_v59 = vsub.s32 4294967266, %v185_v32  ;;  %v187_v60 = vshll.u32 %v178_v50, %v185_v32 }
  0xce   :  { %v188_v61 = vshrl.u32 %v170_v57, %v186_v58  ;;  %v191_v62 = vadd.s32 127, %v190_v59 }
  0xd0   :  { %v189_v54 = vor.u32 %v188_v61, %v187_v60  ;;  %v192_v63 = vshll.u32 %v191_v62, 23 }
  0xd2   :  { %v193_v1 = vor.u32 4788187, %v192_v63  ;;  %v196_v3 = vcvt.s32.f32 %v189_v54 }
  0xd4   :  { %v194_v2 = vand.u32 2147483647, %v193_v1 }
  0xd6   :  { %v197_v4 = vmul.f32 %v196_v3, %v194_v2 }
  0xd8   :  { %v198_v5 = vxor.u32 2147483648, %v197_v4 }
  0xda   :  { %v199_v6 = vsel %vm78_vm12, %v198_v5, %v197_v4 }
  0xdb   :  { %v202_v8 = vsel %vm77_vm13, %v389_v21, %v199_v6 }
  0xdc   :  { %v204_v9 = vmul.f32 %v202_v8, %v202_v8 }
  0xde   :  { %v205_v10 = vmul.f32 -0.001358992, %v204_v9  ;;  %v212_v11 = vmul.f32 -0.00019511016, %v204_v9 }
  0xe0   :  { %v206_v13 = vadd.f32 0.041655596, %v205_v10  ;;  %v213_v14 = vadd.f32 0.008332121, %v212_v11 }
  0xe2   :  { %v207_v16 = vmul.f32 %v206_v13, %v204_v9  ;;  %v214_v17 = vmul.f32 %v213_v14, %v204_v9 }
  0xe4   :  { %v208_v18 = vadd.f32 -0.4999988, %v207_v16  ;;  %v215_v19 = vadd.f32 -0.16666654, %v214_v17 }
  0xe6   :  { %v209_v22 = vmul.f32 %v208_v18, %v204_v9  ;;  %v216_v23 = vmul.f32 %v215_v19, %v204_v9 }
  0xe8   :  { %v210_v24 = vadd.f32 1.0, %v209_v22  ;;  %v217_v25 = vadd.f32 1.0, %v216_v23 }
  0xea   :  { %v218_v27 = vmul.f32 %v217_v25, %v202_v8  ;;  %v227_v28 = vxor.u32 2147483648, %v210_v24 }
  0xec   :  { %v224_v29 = vxor.u32 2147483648, %v218_v27  ;;  %v228_v34 = vsel %vm226_vm15, %v227_v28, %v218_v27 }
  0xee   :  { %v225_v31 = vsel %vm223_vm14, %v210_v24, %v224_v29 }
  0xef   :  { %v229_v35 = vsel %vm222_vm0, %v225_v31, %v228_v34 }
  0xf0   :  { %v230_v36 = vsel %vm219_vm1, nan, %v229_v35 }
  0xf1   :  { %231 = vst [vmem:[#allocation7] sm:$0x3] %v230_v36 }
  0xf2   :  { %242 = dma.vmem_to_hbm [thread:$0]  %s238_s1, 32, %s240_s21, [#allocation4]  }
  0xf3   :  { %352 = dma.done.wait [#allocation4], 32  }
  0xf4   :  { %353 = vsyncadd [#allocation4], 4294967264 }
  0xf5   :  { %247 = vsyncpa [#allocation3], 1 }
  0xf6   :  { %248 = vsyncpa [#allocation6], 1 }
  0xf7   :  { %249 = vsyncpa [#allocation4], 1 }

</bundles_post_ra>
